<compile_context>
chip_gen: v7x
topology: tpu7x:2x2x1
jax: 0.10.0
libtpu: 0.0.40
codegen_flags: <defaults>
</compile_context>

<pallas_src>
import jax
import jax.numpy as jnp
from jax.experimental import pallas as pl
from jax.experimental.pallas import tpu as pltpu


# --------------------------------------------------------------------------
# Kernels
# --------------------------------------------------------------------------

def _mlp_kernel_accout(x_ref, wg_ref, wu_ref, w2_ref, o_ref):
    """f32-output path: accumulate directly into the resident output block."""
    j = pl.program_id(1)
    x = x_ref[...]
    gate = jnp.dot(x, wg_ref[...], preferred_element_type=jnp.float32)
    up = jnp.dot(x, wu_ref[...], preferred_element_type=jnp.float32)
    # SiLU(gate) * up in f32; sigmoid lands on the EUP slot (free under MXU).
    act = (gate * jax.nn.sigmoid(gate)) * up
    down = jnp.dot(act.astype(w2_ref.dtype), w2_ref[...],
                   preferred_element_type=jnp.float32)

    @pl.when(j == 0)
    def _():
        o_ref[...] = down

    @pl.when(j > 0)
    def _():
        o_ref[...] += down


def _mlp_kernel_scratch(x_ref, wg_ref, wu_ref, w2_ref, o_ref, acc_ref):
    """Narrow-output path (e.g. bf16 out): f32 scratch accumulator."""
    j = pl.program_id(1)
    x = x_ref[...]
    gate = jnp.dot(x, wg_ref[...], preferred_element_type=jnp.float32)
    up = jnp.dot(x, wu_ref[...], preferred_element_type=jnp.float32)
    act = (gate * jax.nn.sigmoid(gate)) * up
    down = jnp.dot(act.astype(w2_ref.dtype), w2_ref[...],
                   preferred_element_type=jnp.float32)

    @pl.when(j == 0)
    def _():
        acc_ref[...] = down

    @pl.when(j > 0)
    def _():
        acc_ref[...] += down

    @pl.when(j == pl.num_programs(1) - 1)
    def _():
        o_ref[...] = acc_ref[...].astype(o_ref.dtype)


# --------------------------------------------------------------------------
# Wrapper helpers
# --------------------------------------------------------------------------

def _vmem_capacity_bytes():
    """Physical VMEM per TensorCore (conservative fallback: 64 MiB = v7x)."""
    try:
        return int(pltpu.get_tpu_info().vmem_capacity_bytes)
    except Exception:
        return 64 * 1024 * 1024


def _pick_tile(total, want, align):
    """Largest multiple of `align` <= min(want, total) dividing total, else total."""
    want = min(want, total)
    if total % align == 0:
        t = (want // align) * align
        while t >= align:
            if total % t == 0:
                return t
            t -= align
    return total


def prepare_mlp_weights(w1, w2, compute_dtype=jnp.bfloat16):
    """Call ONCE at weight-load time.

    Splits the merged column-wise W1 [H, 2F] into contiguous gate/up halves
    and casts all weights to the MXU compute dtype, so no per-call weight
    cast / copy traffic is generated on the forward path.
    """
    H, two_f = w1.shape
    F = two_f // 2
    wg = jnp.asarray(w1[:, :F]).astype(compute_dtype)
    wu = jnp.asarray(w1[:, F:]).astype(compute_dtype)
    w2c = jnp.asarray(w2).astype(compute_dtype)
    assert w2c.shape == (F, H), (w2c.shape, F, H)
    return wg, wu, w2c


def chatglm2_mlp(x, wg, wu, w2, *, tm=None, tn=None, out_dtype=None):
    """x: [M, H]; wg/wu: [H, F] (bf16); w2: [F, H] (bf16) -> [M, H]."""
    M, H = x.shape
    Hw, F = wg.shape
    assert Hw == H and wu.shape == (H, F) and w2.shape == (F, H), \
        (x.shape, wg.shape, wu.shape, w2.shape)

    compute_dtype = wg.dtype
    out_dtype = jnp.dtype(out_dtype) if out_dtype is not None else jnp.dtype(x.dtype)
    accumulate_in_out = (out_dtype == jnp.dtype(jnp.float32))

    # ---- generation-aware tile defaults ------------------------------------
    vmem_cap = _vmem_capacity_bytes()
    big_vmem = vmem_cap >= 100 * 1024 * 1024          # v5e / v6e (128 MiB)
    if tm is None:
        tm = 1024 if big_vmem else 512                # keep MXU above the ridge
    if tn is None:
        tn = 512 if big_vmem else 256                 # fit v7x's 64 MiB VMEM

    tm_e = _pick_tile(M, tm, 8)
    tn_e = _pick_tile(F, tn, 128)

    cb = jnp.dtype(compute_dtype).itemsize
    ob = out_dtype.itemsize

    def footprint(tm_, tn_):
        in_b = 2 * (tm_ * H + 2 * H * tn_ + tn_ * H) * cb    # double-buffered inputs
        out_b = 2 * tm_ * H * ob                              # output block
        acc_b = 0 if accumulate_in_out else tm_ * H * 4       # f32 scratch
        return in_b + out_b + acc_b

    # Shrink tiles if the footprint would not fit the physical VMEM budget.
    budget = int(0.80 * vmem_cap)
    while footprint(tm_e, tn_e) > budget:
        new_tn = _pick_tile(F, max(tn_e // 2, 128), 128)
        new_tm = _pick_tile(M, max(tm_e // 2, 8), 8)
        if new_tn < tn_e:
            tn_e = new_tn
        elif new_tm < tm_e:
            tm_e = new_tm
        else:
            break

    n_m = M // tm_e
    n_f = F // tn_e
    assert n_m * tm_e == M and n_f * tn_e == F

    # Per-call cast of activations only (cheap: M*H elements).
    xc = x.astype(compute_dtype)

    est = footprint(tm_e, tn_e)
    vmem_limit = int(min(max(est * 1.25, 32 * 1024 * 1024), 0.85 * vmem_cap))

    cost = pl.CostEstimate(
        flops=6 * M * H * F,                       # gate + up + down GEMMs
        transcendentals=M * F,                     # one sigmoid per gate element
        bytes_accessed=(M * H * cb                 # x read (resident across F axis)
                        + n_m * 3 * H * F * cb     # W1(gate,up)+W2 re-read per token tile
                        + M * H * ob),             # output write
    )

    if accumulate_in_out:
        kernel = _mlp_kernel_accout
        scratch = []
    else:
        kernel = _mlp_kernel_scratch
        scratch = [pltpu.VMEM((tm_e, H), jnp.float32)]

    return pl.pallas_call(
        kernel,
        out_shape=jax.ShapeDtypeStruct((M, H), out_dtype),
        grid_spec=pltpu.PrefetchScalarGridSpec(
            num_scalar_prefetch=0,
            grid=(n_m, n_f),                       # reduction (F) axis last
            in_specs=[
                pl.BlockSpec((tm_e, H), lambda i, j: (i, 0)),   # token tile
                pl.BlockSpec((H, tn_e), lambda i, j: (0, j)),   # gate weight tile
                pl.BlockSpec((H, tn_e), lambda i, j: (0, j)),   # up weight tile
                pl.BlockSpec((tn_e, H), lambda i, j: (j, 0)),   # down-proj tile
            ],
            out_specs=pl.BlockSpec((tm_e, H), lambda i, j: (i, 0)),
            scratch_shapes=scratch,
        ),
        compiler_params=pltpu.CompilerParams(
            dimension_semantics=("parallel", "arbitrary"),
            vmem_limit_bytes=vmem_limit,
        ),
        cost_estimate=cost,
    )(xc, wg, wu, w2)


# --------------------------------------------------------------------------
# Reference + demo
# --------------------------------------------------------------------------

def mlp_reference(x, w1, w2):
    gate_up = x @ w1
    F = w2.shape[0]
    gate, up = gate_up[:, :F], gate_up[:, F:]
    act = jax.nn.silu(gate) * up
    return act @ w2


if __name__ == "__main__":
    # Small shapes consistent with the module: 16 tokens, hidden=64, ffn=256.
    # Small tiles are passed explicitly so the demo exercises a 2x2 grid;
    # real ChatGLM2 sizes (H=4096, F~13696/TP) use the generation-aware
    # defaults (tm=1024/tn=512 on v5e/v6e, tm=512/tn=256 on v7x).
    SEQ, HIDDEN, FFN = 16, 64, 256
    key = jax.random.PRNGKey(0)
    kx, k1, k2 = jax.random.split(key, 3)

    x = jax.random.normal(kx, (SEQ, HIDDEN), dtype=jnp.float32)
    w1 = jax.random.normal(k1, (HIDDEN, 2 * FFN), dtype=jnp.float32) * 0.05
    w2 = jax.random.normal(k2, (FFN, HIDDEN), dtype=jnp.float32) * 0.05

    # One-time weight prep (split merged gate|up, cast to bf16).
    wg, wu, w2c = prepare_mlp_weights(w1, w2)

    ref = mlp_reference(x, w1, w2)

    # f32-output path: accumulates directly into the resident output block.
    out = chatglm2_mlp(x, wg, wu, w2c, tm=8, tn=128)
    out = jax.block_until_ready(out)
    assert out.shape == (SEQ, HIDDEN)
    # bf16 MXU operands with f32 accumulation -> loosened tolerance vs f32 ref.
    assert jnp.allclose(out, ref, atol=5e-2, rtol=5e-2), "f32-out mismatch vs reference"

    # bf16-output path: f32 scratch accumulator + final cast.
    out_bf16 = chatglm2_mlp(x, wg, wu, w2c, tm=8, tn=128, out_dtype=jnp.bfloat16)
    out_bf16 = jax.block_until_ready(out_bf16)
    assert out_bf16.dtype == jnp.bfloat16
    assert jnp.allclose(out_bf16.astype(jnp.float32), ref, atol=8e-2, rtol=8e-2), \
        "bf16-out mismatch vs reference"

    print("KERNEL_OK")
</pallas_src>

<mosaic_0001>
module attributes {stable_mosaic.version = 11 : i64} {
  func.func @_mlp_kernel_accout(%arg0: i32, %arg1: i32, %arg2: memref<8x64xbf16, #tpu.memory_space<vmem>>, %arg3: memref<64x128xbf16, #tpu.memory_space<vmem>>, %arg4: memref<64x128xbf16, #tpu.memory_space<vmem>>, %arg5: memref<128x64xbf16, #tpu.memory_space<vmem>>, %arg6: memref<8x64xf32, #tpu.memory_space<vmem>>) attributes {dimension_semantics = [#tpu.dimension_semantics<parallel>, #tpu.dimension_semantics<arbitrary>], iteration_bounds = array<i64: 2, 2>, scalar_prefetch = 0 : i64, scratch_operands = 0 : i64, tpu.core_type = #tpu.core_type<tc>, window_params = [{transform_indices = @transform_0, window_bounds = array<i64: 8, 64>}, {transform_indices = @transform_1, window_bounds = array<i64: 64, 128>}, {transform_indices = @transform_2, window_bounds = array<i64: 64, 128>}, {transform_indices = @transform_3, window_bounds = array<i64: 128, 64>}, {transform_indices = @transform_4, window_bounds = array<i64: 8, 64>}]} {
    %c0 = arith.constant 0 : index
    %c0_0 = arith.constant 0 : index
    %0 = vector.load %arg2[%c0, %c0_0] : memref<8x64xbf16, #tpu.memory_space<vmem>>, vector<8x64xbf16>
    %c0_1 = arith.constant 0 : index
    %c0_2 = arith.constant 0 : index
    %1 = vector.load %arg3[%c0_1, %c0_2] : memref<64x128xbf16, #tpu.memory_space<vmem>>, vector<64x128xbf16>
    %cst = arith.constant dense<0.000000e+00> : vector<8x128xf32>
    %2 = tpu.matmul %0, %1, %cst {dimension_numbers = #tpu.dot_dimension_numbers<[1], [0], [0], [1], [0, 0, 1, 1], [], []>} : vector<8x64xbf16>, vector<64x128xbf16>, vector<8x128xf32> -> vector<8x128xf32>
    %c0_3 = arith.constant 0 : index
    %c0_4 = arith.constant 0 : index
    %3 = vector.load %arg4[%c0_3, %c0_4] : memref<64x128xbf16, #tpu.memory_space<vmem>>, vector<64x128xbf16>
    %cst_5 = arith.constant dense<0.000000e+00> : vector<8x128xf32>
    %4 = tpu.matmul %0, %3, %cst_5 {dimension_numbers = #tpu.dot_dimension_numbers<[1], [0], [0], [1], [0, 0, 1, 1], [], []>} : vector<8x64xbf16>, vector<64x128xbf16>, vector<8x128xf32> -> vector<8x128xf32>
    %5 = arith.negf %2 : vector<8x128xf32>
    %6 = math.exp %5 : vector<8x128xf32>
    %cst_6 = arith.constant 1.000000e+00 : f32
    %7 = vector.broadcast %cst_6 : f32 to vector<8x128xf32>
    %8 = arith.addf %7, %6 : vector<8x128xf32>
    %9 = arith.divf %7, %8 : vector<8x128xf32>
    %10 = arith.mulf %2, %9 : vector<8x128xf32>
    %11 = arith.mulf %10, %4 : vector<8x128xf32>
    %12 = arith.truncf %11 : vector<8x128xf32> to vector<8x128xbf16>
    %c0_7 = arith.constant 0 : index
    %c0_8 = arith.constant 0 : index
    %13 = vector.load %arg5[%c0_7, %c0_8] : memref<128x64xbf16, #tpu.memory_space<vmem>>, vector<128x64xbf16>
    %cst_9 = arith.constant dense<0.000000e+00> : vector<8x64xf32>
    %14 = tpu.matmul %12, %13, %cst_9 {dimension_numbers = #tpu.dot_dimension_numbers<[1], [0], [0], [1], [0, 0, 1, 1], [], []>} : vector<8x128xbf16>, vector<128x64xbf16>, vector<8x64xf32> -> vector<8x64xf32>
    %c0_i32 = arith.constant 0 : i32
    %15 = arith.cmpi eq, %arg1, %c0_i32 : i32
    %16 = arith.extui %15 : i1 to i32
    %c0_i32_10 = arith.constant 0 : i32
    %17 = arith.cmpi ne, %16, %c0_i32_10 : i32
    scf.if %17 {
      %c0_13 = arith.constant 0 : index
      %c0_14 = arith.constant 0 : index
      %21 = vector.load %arg6[%c0_13, %c0_14] : memref<8x64xf32, #tpu.memory_space<vmem>>, vector<8x64xf32>
      tpu.vector_store %arg6[%c0_13, %c0_14], %14 {strides = array<i32>} : memref<8x64xf32, #tpu.memory_space<vmem>>, vector<8x64xf32>,
    } else {
    }
    %c0_i32_11 = arith.constant 0 : i32
    %18 = arith.cmpi sgt, %arg1, %c0_i32_11 : i32
    %19 = arith.extui %18 : i1 to i32
    %c0_i32_12 = arith.constant 0 : i32
    %20 = arith.cmpi ne, %19, %c0_i32_12 : i32
    scf.if %20 {
      %c0_13 = arith.constant 0 : index
      %c0_14 = arith.constant 0 : index
      %21 = vector.load %arg6[%c0_13, %c0_14] : memref<8x64xf32, #tpu.memory_space<vmem>>, vector<8x64xf32>
      %22 = arith.addf %21, %14 : vector<8x64xf32>
      %c0_15 = arith.constant 0 : index
      %c0_16 = arith.constant 0 : index
      %23 = vector.load %arg6[%c0_15, %c0_16] : memref<8x64xf32, #tpu.memory_space<vmem>>, vector<8x64xf32>
      tpu.vector_store %arg6[%c0_15, %c0_16], %22 {strides = array<i32>} : memref<8x64xf32, #tpu.memory_space<vmem>>, vector<8x64xf32>,
    } else {
    }
    return
  }
  func.func @transform_0(%arg0: i32, %arg1: i32) -> (i32, i32) {
    %c0_i32 = arith.constant 0 : i32
    %c0_i32_0 = arith.constant 0 : i32
    return %arg0, %c0_i32 : i32, i32
  }
  func.func @transform_1(%arg0: i32, %arg1: i32) -> (i32, i32) {
    %c0_i32 = arith.constant 0 : i32
    %c0_i32_0 = arith.constant 0 : i32
    return %c0_i32, %arg1 : i32, i32
  }
  func.func @transform_2(%arg0: i32, %arg1: i32) -> (i32, i32) {
    %c0_i32 = arith.constant 0 : i32
    %c0_i32_0 = arith.constant 0 : i32
    return %c0_i32, %arg1 : i32, i32
  }
  func.func @transform_3(%arg0: i32, %arg1: i32) -> (i32, i32) {
    %c0_i32 = arith.constant 0 : i32
    %c0_i32_0 = arith.constant 0 : i32
    return %arg1, %c0_i32 : i32, i32
  }
  func.func @transform_4(%arg0: i32, %arg1: i32) -> (i32, i32) {
    %c0_i32 = arith.constant 0 : i32
    %c0_i32_0 = arith.constant 0 : i32
    return %arg0, %c0_i32 : i32, i32
  }
}

</mosaic_0001>

<bundles_post_ra>
// kernel: tpu_custom_call.1
= control target key start
LH: loop header
LB: loop body
LE: loop exit
PB: predicated region body
PF: predicated region fallthrough
CT: control target
= control target key end

     0   :  { %9 = vsyncpa [#allocation5], 0  ;;  %s1374_s0 = inlined_call_operand.vmem [shape: bf16[16,64], index: 0, kind: input, shape index: {}]   ;;  %s1375_s1 = inlined_call_operand.vmem [shape: bf16[64,256], index: 1, kind: input, shape index: {}]   ;;  %s1376_s2 = inlined_call_operand.vmem [shape: bf16[64,256], index: 2, kind: input, shape index: {}]   ;;  %s1377_s3 = inlined_call_operand.vmem [shape: bf16[256,64], index: 3, kind: input, shape index: {}]   ;;  %s1378_s4 = inlined_call_operand.hbm [shape: f32[16,64], index: 4, kind: output, shape index: {}]  }
   0x1   :  { %11 = vsyncpa [#allocation5 + $0x1], 0  ;;  %s1164_s15 = smov 0   ;;  %s1166_s16 = smov 0  }
   0x2   :  { %s1168_s17 = smov 0   ;;  %s1170_s18 = smov 0  }
   0x3   :  { %s1172_s19 = smov 0   ;;  %s1174_s20 = smov 0  }
   0x4   :  { %s1176_s21 = smov 0   ;;  %s1178_s22 = smov 0  }
   0x5   :  { %s1180_s23 = smov 0   ;;  %s1182_s24 = smov 0  }
   0x6 LB: > { %s812_s25 = sadd.s32 4294967295, %s1134_s24   ;;  %s813_s26 = sadd.s32 4294967294, %s1134_s24   ;;  %s1134_s24 = sphi %s1182_s24, %s17_s24   ;;  %s1130_s23 = sphi %s1180_s23, %s1390_s23   ;;  %s1126_s22 = sphi %s1178_s22, %s1389_s22   ;;  %s1122_s21 = sphi %s1176_s21, %s1388_s21   ;;  %s1118_s20 = sphi %s1174_s20, %s1387_s20   ;;  %s1114_s19 = sphi %s1172_s19, %s1386_s19   ;;  %s1110_s18 = sphi %s1170_s18, %s1385_s18   ;;  %s1106_s17 = sphi %s1168_s17, %s1384_s17   ;;  %s1102_s16 = sphi %s1166_s16, %s1383_s16   ;;  %s1098_s15 = sphi %s1164_s15, %s1382_s15  }
   0x7   : > { %s26_s27 = sadd.s32 1, %s1126_s22  ;;  %s29_s28 = sadd.s32 1, %s1130_s23 }
   0x8   : > { %p27_p0 = scmp.ge.s32.totalorder %s26_s27, 2  ;;  %s62_s29 = sadd.s32 1, %s1114_s19 }
   0x9   : > { %p69_p1 = scmp.ne.s32.totalorder %s1114_s19, %s1110_s18  ;;  %p70_p2 = scmp.eq.s32.totalorder %s1134_s24, 0 }
   0xa   : > { %s1392_s27 = smov (%p27_p0, %s26_s27), 0  ;;  %s1394_s28 = smov (!%p27_p0, %s29_s28), %s1130_s23 }
   0xb   : > { %s59_s30 = ssub.s32 %s1126_s22, %s1392_s27  ;;  %p1227_p3 = por %p70_p2, %p69_p1 }
   0xc   : > { %p31_p4 = scmp.ge.s32.totalorder %s1394_s28, 2  ;;  %p60_p5 = scmp.eq.s32.totalorder %s59_s30, 0 }
   0xd   : > { %s140_s6 = sadd.s32 1, %s1106_s17  ;;  %p150_p6 = scmp.ne.s32.totalorder %s1106_s17, %s1102_s16 }
   0xe   : > { %s1396_s28 = smov (%p31_p4, %s1394_s28), 0  ;;  %p151_p7 = scmp.eq.s32.totalorder %s812_s25, 3 }
   0xf   : > { %s1237_s7 = scalar_select %p60_p5, %s1114_s19, %s62_s29  }
  0x10   : > { %s137_s8 = ssub.s32 %s1130_s23, %s1396_s28  ;;  %p156_p9 = scmp.ne.s32.totalorder %s1102_s16, %s1098_s15 }
  0x11   : > { %p138_p8 = scmp.eq.s32.totalorder %s137_s8, 0  ;;  %p1243_p10 = por %p151_p7, %p150_p6 }
  0x12   : > { %p157_p11 = scmp.eq.s32.totalorder %s813_s26, 3  ;;  %p815_p13 = scmp.ge.s32.totalorder %s1134_s24, 4 }
  0x13   : > { %s1248_s10 = scalar_select %p138_p8, %s1106_s17, %s140_s6  }
  0x14   : > { %p1250_p12 = por %p157_p11, %p156_p9  ;;  %173 = sbr.rel (%p815_p13) target bundleno = 45 (0x2d), region = 16 }
  0x1b   : > { %183 = sbr.rel (!%p1227_p3) target bundleno = 36 (0x24), region = 24  ;;  %s185_s12 = sand.u32 (%p1227_p3), 1, %s1114_s19  }
  0x1c   : > { %s817_s13 = sshll.u32 (%p1227_p3), %s1126_s22, 2  ;;  %s816_s14 = sshll.u32 (%p1227_p3), %s185_s12, 5 }
  0x1d   : > { %s189_s26 = scalar_lea.vmem (%p1227_p3), %s1375_s1, %s817_s13  ;;  %s187_s30 = scalar_lea.vmem (%p1227_p3), [#allocation2], %s816_s14 }
  0x1e   : > { %v205_v0 = vld [vmem:[%s189_s26] sm:$0xf] (%p1227_p3)  ;;  %v207_v1 = vld [vmem:[%s189_s26 + $0x8] sm:$0xf] (%p1227_p3)  ;;  %v209_v2 = vld [vmem:[%s189_s26 + $0x10] sm:$0xf] (%p1227_p3) }
  0x1f   : > { %206 = vst [vmem:[%s187_s30] sm:$0xf] (%p1227_p3), %v205_v0  ;;  %208 = vst [vmem:[%s187_s30 + $0x4] sm:$0xf] (%p1227_p3), %v207_v1  ;;  %v211_v3 = vld [vmem:[%s189_s26 + $0x18] sm:$0xf] (%p1227_p3) }
  0x20   : > { %v213_v4 = vld [vmem:[%s189_s26 + $0x20] sm:$0xf] (%p1227_p3)  ;;  %210 = vst [vmem:[%s187_s30 + $0x8] sm:$0xf] (%p1227_p3), %v209_v2  ;;  %212 = vst [vmem:[%s187_s30 + $0xc] sm:$0xf] (%p1227_p3), %v211_v3 }
  0x21   : > { %214 = vst [vmem:[%s187_s30 + $0x10] sm:$0xf] (%p1227_p3), %v213_v4  ;;  %v215_v5 = vld [vmem:[%s189_s26 + $0x28] sm:$0xf] (%p1227_p3)  ;;  %v217_v6 = vld [vmem:[%s189_s26 + $0x30] sm:$0xf] (%p1227_p3) }
  0x22   : > { %v219_v7 = vld [vmem:[%s189_s26 + $0x38] sm:$0xf]  ;;  %216 = vst [vmem:[%s187_s30 + $0x14] sm:$0xf] %v215_v5  ;;  %218 = vst [vmem:[%s187_s30 + $0x18] sm:$0xf] %v217_v6 }
  0x23   : > { %220 = vst [vmem:[%s187_s30 + $0x1c] sm:$0xf] %v219_v7 }
  0x24 PF: > { %259 = sbr.rel (!%p1227_p3) target bundleno = 45 (0x2d), region = 65  ;;  %s261_s6 = sand.u32 (%p1227_p3), 1, %s1114_s19  }
  0x25   : > { %s819_s8 = sshll.u32 (%p1227_p3), %s1126_s22, 2  ;;  %s818_s12 = sshll.u32 (%p1227_p3), %s261_s6, 5 }
  0x26   : > { %s265_s25 = scalar_lea.vmem (%p1227_p3), %s1376_s2, %s819_s8  ;;  %s263_s29 = scalar_lea.vmem (%p1227_p3), [#allocation3], %s818_s12 }
  0x27   : > { %v281_v8 = vld [vmem:[%s265_s25] sm:$0xf] (%p1227_p3)  ;;  %v283_v9 = vld [vmem:[%s265_s25 + $0x8] sm:$0xf] (%p1227_p3)  ;;  %v285_v10 = vld [vmem:[%s265_s25 + $0x10] sm:$0xf] (%p1227_p3) }
  0x28   : > { %282 = vst [vmem:[%s263_s29] sm:$0xf] (%p1227_p3), %v281_v8  ;;  %284 = vst [vmem:[%s263_s29 + $0x4] sm:$0xf] (%p1227_p3), %v283_v9  ;;  %v287_v11 = vld [vmem:[%s265_s25 + $0x18] sm:$0xf] (%p1227_p3) }
  0x29   : > { %v289_v12 = vld [vmem:[%s265_s25 + $0x20] sm:$0xf] (%p1227_p3)  ;;  %286 = vst [vmem:[%s263_s29 + $0x8] sm:$0xf] (%p1227_p3), %v285_v10  ;;  %288 = vst [vmem:[%s263_s29 + $0xc] sm:$0xf] (%p1227_p3), %v287_v11 }
  0x2a   : > { %290 = vst [vmem:[%s263_s29 + $0x10] sm:$0xf] (%p1227_p3), %v289_v12  ;;  %v291_v13 = vld [vmem:[%s265_s25 + $0x28] sm:$0xf] (%p1227_p3)  ;;  %v293_v14 = vld [vmem:[%s265_s25 + $0x30] sm:$0xf] (%p1227_p3) }
  0x2b   : > { %v295_v15 = vld [vmem:[%s265_s25 + $0x38] sm:$0xf]  ;;  %292 = vst [vmem:[%s263_s29 + $0x14] sm:$0xf] %v291_v13  ;;  %294 = vst [vmem:[%s263_s29 + $0x18] sm:$0xf] %v293_v14 }
  0x2c   : > { %296 = vst [vmem:[%s263_s29 + $0x1c] sm:$0xf] %v295_v15 }
  0x2d PF: > { %p820_p0 = scmp.ge.s32.totalorder %s1134_s24, 1  ;;  %p343_p1 = scmp.lt.s32.totalorder %s1134_s24, 5 }
  0x2f   : > { %p344_p2 = pnand %p820_p0, %p343_p1 }
  0x30   : > { %s392_s5 = sand.u32 (!%p344_p2), 1, %s1102_s16   ;;  %s350_s26 = sand.u32 (!%p344_p2), 1, %s1110_s18   ;;  %v1136_v16 = vmov (!%p344_p2), 0.0   ;;  %vm1137_vm0 = vmmov (!%p344_p2), 0   ;;  %vm439_vm1 = vcmask (!%p344_p2), 523264  }
  0x31   : > { %347 = sbr.rel (%p344_p2) target bundleno = 560 (0x230), region = 110  ;;  %s1275_s30 = sshll.u32 (!%p344_p2), %s392_s5, 3  ;;  %871 = vmatprep.subr.bf16.mxu1 (!%p344_p2), %v1136_v16  ;;  %879 = vmatprep.mubr.msk.bf16.mxu1 (!%p344_p2), %vm1137_vm0, %v1136_v16 }
  0x32   : > { %s821_s6 = sshll.u32 (!%p344_p2), %s350_s26, 5  ;;  %895 = vmatprep.subr.bf16.mxu0 (!%p344_p2), %v1136_v16  ;;  %911 = vmatprep.mubr.msk.bf16.mxu0 (!%p344_p2), %vm1137_vm0, %v1136_v16  ;;  %p395_p3 = scmp.lt.s32.totalorder (!%p344_p2), %s1122_s21, 1 }
  0x33   : > { %s352_s8 = scalar_lea.vmem (!%p344_p2), [#allocation2], %s821_s6  ;;  %s359_s12 = scalar_lea.vmem (!%p344_p2), [#allocation3], %s821_s6 }
  0x34   : > { %v1004_v17 = vld [vmem:[%s352_s8] sm:$0xff] (!%p344_p2)   ;;  %v1005_v18 = vld [vmem:[%s352_s8 + $0x8] sm:$0xff] (!%p344_p2)   ;;  %v1006_v19 = vld [vmem:[%s352_s8 + $0x10] sm:$0xff] (!%p344_p2)   ;;  %s825_s26 = sshll.u32 (!%p344_p2), %s1118_s20, 4  ;;  %p846_p5 = scmp.ne.s32.totalorder (!%p344_p2), %s1118_s20, 0 }
  0x35   : > { %872 = vmatpush3.bf16.msra.mxu1 (!%p344_p2), %v1004_v17  ;;  %v1007_v20 = vld [vmem:[%s352_s8 + $0x18] sm:$0xff] (!%p344_p2)   ;;  %v1008_v22 = vld [vmem:[%s359_s12] sm:$0xff] (!%p344_p2)   ;;  %v1009_v23 = vld [vmem:[%s359_s12 + $0x8] sm:$0xff] (!%p344_p2)   ;;  %p400_p4 = scmp.lt.s32.totalorder (!%p344_p2), %s825_s26, 31 }
  0x36   : > { %873 = vmatprep.subr.bf16.mxu1 (!%p344_p2), %v1136_v16  ;;  %v1010_v24 = vld [vmem:[%s359_s12 + $0x10] sm:$0xff] (!%p344_p2)   ;;  %v1011_v25 = vld [vmem:[%s359_s12 + $0x18] sm:$0xff] (!%p344_p2)   ;;  %s394_s12 = scalar_lea.vmem (!%p344_p2), [#allocation4], %s1275_s30 }
  0x38   : > { %s396_s18 = scalar_select %p395_p3, %s1122_s21, 1 }
  0x39   : > { %874 = vmatpush3.bf16.msra.mxu1 %v1005_v18  ;;  %s1398_s26 = smov (!%p400_p4, %s825_s26), 31 }
  0x3a   : > { %875 = vmatprep.subr.bf16.mxu1 %v1136_v16  ;;  %s824_s13 = sshll.u32 %s396_s18, 2  ;;  %s826_s6 = sshll.u32 %s1398_s26, 2 }
  0x3b   : > { %s398_s29 = scalar_lea.vmem %s1374_s0, %s824_s13  ;;  %s403_s13 = scalar_lea.vmem %s1377_s3, %s826_s6 }
  0x3c   : > { %v406_v21 = vld [vmem:[%s398_s29] sm:$0xf]  ;;  %v1013_v27 = vld [vmem:[%s403_s13 + $0x8] sm:$0xff]   ;;  %v1014_v28 = vld [vmem:[%s403_s13 + $0x10] sm:$0xff]  }
  0x3d   : > { %876 = vmatpush3.bf16.msra.mxu1 %v1006_v19  ;;  %v1012_v26 = vld [vmem:[%s403_s13] sm:$0xff]   ;;  %v1015_v29 = vld [vmem:[%s403_s13 + $0x18] sm:$0xff]   ;;  %v1017_v31 = vld [vmem:[%s403_s13 + $0x28] sm:$0xff]  }
  0x3e   : > { %877 = vmatprep.subr.bf16.mxu1 %v1136_v16  ;;  %896 = vmatpush3.bf16.msra.mxu0 %v1012_v26  ;;  %v1016_v30 = vld [vmem:[%s403_s13 + $0x20] sm:$0xff]   ;;  %v1018_v32 = vld [vmem:[%s403_s13 + $0x30] sm:$0xff]   ;;  %v1019_v33 = vld [vmem:[%s403_s13 + $0x38] sm:$0xff]  }
  0x3f   : > { %897 = vmatprep.subr.bf16.mxu0 %v1136_v16 }
  0x41   : > { %878 = vmatpush3.bf16.msra.mxu1 %v1007_v20 }
  0x42   : > { %883 = vmatprep.subr.bf16.mxu1 %v1136_v16  ;;  %898 = vmatpush3.bf16.msra.mxu0 %v1013_v27 }
  0x43   : > { %899 = vmatprep.subr.bf16.mxu0 %v1136_v16 }
  0x44   : > { %880 = vmatmul.mubr.msk.bf16.vlgmr.msra.gmra.mrb[0].mxu1 %vm439_vm1, %v406_v21 }
  0x45   : > { %884 = vmatpush3.bf16.msra.mxu1 %v1008_v22  ;;  %891 = vmatprep.mubr.msk.bf16.mxu1 %vm1137_vm0, %v1136_v16 }
  0x46   : > { %885 = vmatprep.subr.bf16.mxu1 %v1136_v16  ;;  %900 = vmatpush3.bf16.msra.mxu0 %v1014_v28 }
  0x47   : > { %901 = vmatprep.subr.bf16.mxu0 %v1136_v16 }
  0x49   : > { %886 = vmatpush3.bf16.msra.mxu1 %v1009_v23 }
  0x4a   : > { %887 = vmatprep.subr.bf16.mxu1 %v1136_v16  ;;  %902 = vmatpush3.bf16.msra.mxu0 %v1015_v29 }
  0x4b   : > { %903 = vmatprep.subr.bf16.mxu0 %v1136_v16 }
  0x4d   : > { %888 = vmatpush3.bf16.msra.mxu1 %v1010_v24 }
  0x4e   : > { %889 = vmatprep.subr.bf16.mxu1 %v1136_v16  ;;  %904 = vmatpush3.bf16.msra.mxu0 %v1016_v30 }
  0x4f   : > { %905 = vmatprep.subr.bf16.mxu0 %v1136_v16 }
  0x51   : > { %890 = vmatpush3.bf16.msra.mxu1 %v1011_v25 }
  0x52   : > { %906 = vmatpush3.bf16.msra.mxu0 %v1017_v31 }
  0x53   : > { %907 = vmatprep.subr.bf16.mxu0 %v1136_v16 }
  0x54   : > { %892 = vmatmul.mubr.msk.bf16.vlgmr.msra.gmra.mrb[4].mxu1 %vm439_vm1, %v406_v21 }
  0x56   : > { %908 = vmatpush3.bf16.msra.mxu0 %v1018_v32 }
  0x57   : > { %909 = vmatprep.subr.bf16.mxu0 %v1136_v16 }
  0x5a   : > { %910 = vmatpush3.bf16.msra.mxu0 %v1019_v33 }
 0x117   : > { %v477_v34 = vpop.f32.mrb[0].mxu1 }
 0x118   : > { %v837_v35 = vmul.f32 -1.442695, %v477_v34  ;;  %v881_v36 = vpop.f32.mrb[1].mxu1 }
 0x119   : > { %v480_v37 = vpop.f32.mrb[2].mxu1 }
 0x11a   : > { %1020 = vpow2.f32 %v837_v35  ;;  %v882_v38 = vpop.f32.mrb[3].mxu1 }
 0x124   : > { %v1021_v39 = vpop.eup %1020 }
 0x125   : > { %v558_v40 = vadd.f32 1.0, %v1021_v39 }
 0x127   : > { %1022 = vrcp.f32 %v558_v40  ;;  %v549_v41 = vpop.f32.mrb[4].mxu1 }
 0x128   : > { %v893_v42 = vpop.f32.mrb[5].mxu1 }
 0x129   : > { %v552_v43 = vpop.f32.mrb[6].mxu1 }
 0x12a   : > { %v894_v44 = vpop.f32.mrb[7].mxu1 }
 0x131   : > { %v1023_v45 = vpop.eup %1022 }
 0x132   : > { %v561_v46 = vmul.f32 %v1023_v45, %v477_v34 }
 0x134   : > { %v562_v47 = vmul.f32 %v561_v46, %v549_v41 }
 0x136   : > { %v563_v48 = vpack.c.bf16 %v562_v47, %v562_v47 }
 0x138   : > { %912 = vmatmul.mubr.bf16.vlgmr.msra.gmra.mrb[0].mxu0 %v563_v48 }
 0x208   : > { %671 = sbr.rel (%p846_p5) target bundleno = 527 (0x20f), region = 122 }
 0x20b   : > { %v662_v49 = vpop.f32.mrb[0].mxu0 }
 0x20c   : > { %v913_v50 = vpop.f32.mrb[1].mxu0  ;;  %672 = vst.msk [vmem:[%s394_s12] sm:$0xff] (!%p846_p5), %vm439_vm1, %v662_v49 }
 0x20d   : > { %v665_v51 = vpop.f32.mrb[2].mxu0 }
 0x20e   : > { %v914_v52 = vpop.f32.mrb[3].mxu0 }
 0x20f PF: > { %p847_p6 = scmp.le.s32.totalorder %s1118_s20, 0 }
 0x211   : > { %676 = sbr.rel (%p847_p6) target bundleno = 536 (0x218), region = 126 }
 0x213   : > { %v677_v53 = vld [vmem:[%s394_s12] sm:$0xff] (!%p847_p6) }
 0x214   : > { %v678_v54 = vadd.f32 (!%p847_p6), %v677_v53, %v662_v49 }
 0x216   : > { %679 = vst.msk [vmem:[%s394_s12] sm:$0xff] (!%p847_p6), %vm439_vm1, %v678_v54 }
 0x218 PF: > { %s849_s14 = sshll.u32 %s1122_s21, 7  ;;  %s694_s26 = sshll.u32 %s394_s12, 4  ;;  %s695_s26 = int_to_ptr.vmem [resolvable:$true] %s694_s26 }
 0x219   : > { %s1319_s29 = scalar_lea.hbm %s1378_s4, %s849_s14  ;;  %s681_s6 = scalar_lea.sflag [#allocation5], %s392_s5 }
 0x21a   : > { %s1024_s20 = scalar_lea.vmem %s695_s26, 128  ;;  %s1138_s8 = smov [#allocation4]  }
 0x21b   : > { %p1025_p7 = scmp.ne.s32.totalorder %s695_s26, %s1024_s20  ;;  %s1028_s18 = sshll.u32 %s1138_s8, 4  ;;  %s1029_s18 = int_to_ptr.vmem [resolvable:$false] %s1028_s18 }
 0x21c   : > { %s1030_s13 = scalar_lea.vmem %s1029_s18, 256  ;;  %p1031_p11 = scmp.lt.s32.totalorder %s695_s26, %s1029_s18 }
 0x21d   : > { %p1026_p8 = pnand %p1025_p7, %p1243_p10  ;;  %p1032_p13 = scmp.lt.s32.totalorder %s1030_s13, %s1024_s20 }
 0x21f   : > { %p1027_p9 = pneg %p1026_p8  ;;  %p1033_p0 = por %p1032_p13, %p1031_p11 }
 0x221   : > { %p1034_p1 = pnand %p1033_p0, %p1027_p9 }
 0x223   : > { %1037 = shalt.err (!%p1034_p1)
}
 0x224   : > { %s1038_s21 = scalar_lea.hbm %s1319_s29, 128  ;;  %s1042_s14 = scalar_lea.hbm %s1378_s4, 256 }
 0x225   : > { %p1039_p2 = scmp.ne.s32.totalorder %s1319_s29, %s1038_s21  ;;  %p1043_p5 = scmp.lt.u32.totalorder %s1319_s29, %s1378_s4 }
 0x226   : > { %p1044_p6 = scmp.lt.u32.totalorder %s1042_s14, %s1038_s21  ;;  %p1046_p8 = scmp.lt.u32.totalorder %s1038_s21, %s1319_s29 }
 0x227   : > { %p1040_p3 = pnand %p1039_p2, %p1243_p10 }
 0x228   : > { %p1045_p7 = por %p1044_p6, %p1043_p5 }
 0x229   : > { %p1041_p4 = pneg %p1040_p3 }
 0x22a   : > { %p1047_p9 = por %p1046_p8, %p1045_p7 }
 0x22c   : > { %p1048_p11 = pnand %p1047_p9, %p1041_p4 }
 0x22e   : > { %1051 = shalt.err (!%p1048_p11)
}
 0x22f   : > { %915 = dma.vmem_to_hbm [thread:$0]  (%p1243_p10), %s695_s26, 128, %s1319_s29, %s681_s6  }
 0x230 PF: > { %p921_p13 = scmp.ge.s32.totalorder %s1134_s24, 2  ;;  %s706_s20 = sand.u32 1, %s1098_s15  }
 0x231   : > { %s707_s8 = scalar_lea.sflag [#allocation5], %s706_s20 }
 0x232   : > { %p918_p0 = pnand %p921_p13, %p1250_p12 }
 0x234   : > { %1093 = dma.done.wait (!%p918_p0), %s707_s8, 128  }
 0x235   : > { %1095 = vsyncadd (!%p918_p0), %s707_s8, 4294967168  ;;  %s17_s24 = sadd.s32 1, %s1134_s24   ;;  %s1382_s15 = smov %s1102_s16 }
 0x236   : > { %p14_p1 = scmp.ge.s32.totalorder %s17_s24, 6   ;;  %s1383_s16 = smov %s1106_s17 }
 0x237   : > { %s1384_s17 = smov %s1248_s10  ;;  %s1385_s18 = smov %s1114_s19 }
 0x238   : > { %s1386_s19 = smov %s1237_s7  ;;  %s1387_s20 = smov %s1126_s22 }
 0x239   : > { %s1388_s21 = smov %s1130_s23  ;;  %s1389_s22 = smov %s1392_s27 }
 0x23a   : > { %s1390_s23 = smov %s1396_s28  ;;  %16 = sbr.rel (!%p14_p1) target bundleno = 6 (0x6), region = 180 }
 0x241   :  { %712 = vsyncpa [#allocation5], 1 }
 0x242   :  { %714 = vsyncpa [#allocation5 + $0x1], 1 }

</bundles_post_ra>
